<compile_context>
chip_gen: v6e
topology: v6e:2x2x1
jax: 0.10.0
libtpu: 0.0.40
codegen_flags: <defaults>
</compile_context>

<pallas_src>
import functools

import jax
import jax.numpy as jnp
from jax import lax
from jax.experimental import pallas as pl
from jax.experimental.pallas import tpu as pltpu


_MAX_GROUP = 32                     # fold at most this many instances per grid step
_STEP_BYTES_CAP = 4 * 1024 * 1024   # per-step block cap: 1-4 MiB tiles ~85% HBM roofline


def _round_up(v, m):
    return ((v + m - 1) // m) * m


def _sublane(itemsize):
    # One f32 vreg tile is (8, 128); sub-32-bit dtypes pack along sublanes.
    return max(8, 32 // int(itemsize))


def _vmem_capacity_bytes():
    try:
        return int(pltpu.get_tpu_info().vmem_capacity_bytes)
    except Exception:
        return 64 * 1024 * 1024     # conservative: v7x per-TensorCore VMEM


def _block_bytes(g, batch, dim_in, dim_out, in_dtype, out_dtype,
                 use_bias, bias_dtype, dense_out):
    """(sublane, lane)-padded VMEM footprint of one grid step's blocks (single copy)."""
    in_item = jnp.dtype(in_dtype).itemsize
    out_item = jnp.dtype(out_dtype).itemsize
    sub_in, sub_out = _sublane(in_item), _sublane(out_item)
    x_b = g * _round_up(batch, sub_in) * _round_up(dim_in, 128) * in_item
    w_b = g * _round_up(dim_out, sub_in) * _round_up(dim_in, 128) * in_item
    b_b = 0
    if use_bias:
        b_item = jnp.dtype(bias_dtype).itemsize
        b_b = g * _sublane(b_item) * _round_up(dim_out, 128) * b_item
    if dense_out:
        o_b = _round_up(batch, sub_out) * _round_up(g * dim_out, 128) * out_item
    else:
        o_b = g * _round_up(batch, sub_out) * _round_up(dim_out, 128) * out_item
    return x_b + w_b + b_b + o_b


def _choose_group(n_inst, dim_out, block_bytes_fn, vmem_budget):
    """Largest divisor of n_inst whose double-buffered padded block fits, preferring
    >=4 (even) grid steps so both v7x TensorCores keep a pipelined queue."""
    divisors = [g for g in range(1, min(n_inst, _MAX_GROUP) + 1) if n_inst % g == 0]
    fits = [g for g in divisors
            if block_bytes_fn(g) <= _STEP_BYTES_CAP
            and 2 * block_bytes_fn(g) <= vmem_budget]
    if not fits:
        return 1

    def pick(cands):
        # Tie-break: lane-dense output slab (g*dim_out % 128 == 0), then larger g.
        return max(cands, key=lambda g: ((g * dim_out) % 128 == 0, g))

    tier1 = [g for g in fits if (n_inst // g) >= 4 and (n_inst // g) % 2 == 0]
    if tier1:
        return pick(tier1)
    tier2 = [g for g in fits if (n_inst // g) >= 2]
    if tier2:
        return pick(tier2)
    return pick(fits)


def _make_kernel(use_bias, dense_out):
    def kernel(*refs):
        if use_bias:
            x_ref, w_ref, b_ref, o_ref = refs
        else:
            x_ref, w_ref, o_ref = refs
        # x_ref: (G, B, K); w_ref: (G, N, K) in the ORIGINAL torch layout.
        # Contract W's last dim on the MXU (f32 accumulation); Mosaic does the small
        # on-chip RHS relayout, overlapped with the next block's DMA.
        acc = lax.dot_general(
            x_ref[...], w_ref[...],
            dimension_numbers=(((2,), (2,)), ((0,), (0,))),
            preferred_element_type=jnp.float32,
        )                                                    # (G, B, N) f32
        if use_bias:
            acc = acc + b_ref[...].astype(jnp.float32)       # (G, 1, N) broadcasts
        if dense_out:
            # Lane-dense (1, B, G*N) output slab: dense HBM writeback / out_spec.
            g, _, n = acc.shape
            for i in range(g):                               # static unroll over G
                o_ref[0, :, i * n:(i + 1) * n] = acc[i].astype(o_ref.dtype)
        else:
            o_ref[...] = acc.astype(o_ref.dtype)
    return kernel


@functools.partial(jax.jit, static_argnames=("use_bias", "compute_dtype"))
def multiple_linear(x, weight, bias=None, *, use_bias=True, compute_dtype=None):
    """out[n] = x[n] @ weight[n].T (+ bias[n])  — torch.baddbmm / bmm semantics.

    compute_dtype=jnp.bfloat16 halves HBM traffic for f32 inputs; accumulation is
    always f32 on the MXU.
    """
    n_inst, batch, dim_in = x.shape
    dim_out = weight.shape[1]
    out_dtype = x.dtype

    if compute_dtype is not None:
        x = x.astype(compute_dtype)
        weight = weight.astype(compute_dtype)
    bias_dtype = bias.dtype if use_bias else jnp.float32

    dense_out = (dim_out % 128) != 0      # lane-sparse outputs get a dense (B, G*N) slab

    cap = _vmem_capacity_bytes()
    vmem_budget = (cap * 3) // 4          # headroom for Mosaic scratch / semaphores

    def blk(g):
        return _block_bytes(g, batch, dim_in, dim_out, x.dtype, out_dtype,
                            use_bias, bias_dtype, dense_out)

    g = _choose_group(n_inst, dim_out, blk, vmem_budget)
    n_groups = n_inst // g

    vmem_limit = int(min(vmem_budget,
                         max(32 * 1024 * 1024, 2 * blk(g) + 4 * 1024 * 1024)))

    in_item = jnp.dtype(x.dtype).itemsize
    out_item = jnp.dtype(out_dtype).itemsize
    bytes_accessed = (
        n_inst * batch * dim_in * in_item                                  # x
        + n_inst * dim_out * dim_in * in_item                              # W (once)
        + (n_inst * dim_out * jnp.dtype(bias_dtype).itemsize if use_bias else 0)
        + n_inst * batch * dim_out * out_item                              # out
    )
    cost = pl.CostEstimate(flops=2 * n_inst * batch * dim_in * dim_out,
                           transcendentals=0, bytes_accessed=bytes_accessed)

    compiler_params = pltpu.CompilerParams(
        dimension_semantics=("parallel",),
        vmem_limit_bytes=vmem_limit,
    )

    in_specs = [
        pl.BlockSpec((g, batch, dim_in), lambda i: (i, 0, 0)),
        pl.BlockSpec((g, dim_out, dim_in), lambda i: (i, 0, 0)),   # original W layout
    ]
    operands = [x, weight]
    if use_bias:
        in_specs.append(pl.BlockSpec((g, 1, dim_out), lambda i: (i, 0, 0)))
        operands.append(bias.reshape(n_inst, 1, dim_out))

    if dense_out:
        out_shape = jax.ShapeDtypeStruct((n_groups, batch, g * dim_out), out_dtype)
        out_spec = pl.BlockSpec((1, batch, g * dim_out), lambda i: (i, 0, 0))
    else:
        out_shape = jax.ShapeDtypeStruct((n_inst, batch, dim_out), out_dtype)
        out_spec = pl.BlockSpec((g, batch, dim_out), lambda i: (i, 0, 0))

    out = pl.pallas_call(
        _make_kernel(use_bias, dense_out),
        out_shape=out_shape,
        grid_spec=pltpu.PrefetchScalarGridSpec(
            num_scalar_prefetch=0,
            grid=(n_groups,),
            in_specs=in_specs,
            out_specs=out_spec,
        ),
        compiler_params=compiler_params,
        cost_estimate=cost,
    )(*operands)

    if dense_out:
        # Un-shuffle the lane-dense slab back to (n_inst, batch, dim_out).
        out = (out.reshape(n_groups, batch, g, dim_out)
                  .transpose(0, 2, 1, 3)
                  .reshape(n_inst, batch, dim_out))
    return out


def init_multiple_linear_params(key, dim_in, dim_out, n_instances, bias=True,
                                init="orthogonal", dtype=jnp.float32):
    """Deterministic parameter init mirroring the PyTorch module's __init__."""
    keys = jax.random.split(key, n_instances)
    if init == "orthogonal":
        init_fn = jax.nn.initializers.orthogonal()
    elif init == "xavier":
        init_fn = jax.nn.initializers.glorot_uniform()
    else:
        raise Exception()
    ws = [init_fn(keys[i], (dim_out, dim_in), dtype) for i in range(n_instances)]
    weight = jnp.stack(ws, axis=0)                      # (n_inst, dim_out, dim_in)
    b = jnp.zeros((n_instances, dim_out), dtype) if bias else None
    return weight, b


if __name__ == "__main__":
    key = jax.random.PRNGKey(0)
    ks = jax.random.split(key, 10)

    # Small-integer-valued data makes every check EXACT regardless of the MXU's
    # f32-multiply precision policy (products and f32 accumulation are exact).
    def randint_f32(k, shape):
        return jax.random.randint(k, shape, -4, 5).astype(jnp.float32)

    def ref_fn(x, w, b=None):
        r = jnp.einsum("nbi,noi->nbo", x, w, precision=jax.lax.Precision.HIGHEST)
        return r if b is None else r + b[:, None, :]

    n_inst, batch, dim_in, dim_out = 4, 8, 32, 16
    x = randint_f32(ks[0], (n_inst, batch, dim_in))
    w = randint_f32(ks[1], (n_inst, dim_out, dim_in))
    b = randint_f32(ks[2], (n_inst, dim_out))

    # 1) f32 + bias (lane-dense output path, dim_out < 128).
    out = jax.block_until_ready(multiple_linear(x, w, b, use_bias=True))
    assert out.shape == (n_inst, batch, dim_out)
    assert jnp.allclose(out, ref_fn(x, w, b), atol=1e-6)

    # 2) f32, no bias (bmm path).
    out_nb = jax.block_until_ready(multiple_linear(x, w, use_bias=False))
    assert jnp.allclose(out_nb, ref_fn(x, w), atol=1e-6)

    # 3) bf16 compute (halves HBM traffic; accumulation stays f32).
    out_bf = jax.block_until_ready(
        multiple_linear(x, w, b, use_bias=True, compute_dtype=jnp.bfloat16))
    assert jnp.allclose(out_bf, ref_fn(x, w, b), atol=1e-6)

    # 4) dim_out multiple of 128: already-lane-dense output path.
    x4 = randint_f32(ks[3], (2, batch, dim_in))
    w4 = randint_f32(ks[4], (2, 128, dim_in))
    b4 = randint_f32(ks[5], (2, 128))
    out4 = jax.block_until_ready(multiple_linear(x4, w4, b4, use_bias=True))
    assert jnp.allclose(out4, ref_fn(x4, w4, b4), atol=1e-6)

    # 5) More instances -> instance folding (G > 1) + lane-dense slab + un-shuffle.
    x5 = randint_f32(ks[6], (16, batch, dim_in))
    w5 = randint_f32(ks[7], (16, dim_out, dim_in))
    b5 = randint_f32(ks[8], (16, dim_out))
    out5 = jax.block_until_ready(multiple_linear(x5, w5, b5, use_bias=True))
    assert jnp.allclose(out5, ref_fn(x5, w5, b5), atol=1e-6)

    # 6) Smoke test with the module's own (orthogonal) init — same shapes as (1).
    w_o, b_o = init_multiple_linear_params(ks[9], dim_in, dim_out, n_inst,
                                           bias=True, init="orthogonal")
    out_o = jax.block_until_ready(multiple_linear(x, w_o, b_o, use_bias=True))
    assert out_o.shape == (n_inst, batch, dim_out)
    assert bool(jnp.all(jnp.isfinite(out_o)))

    print("KERNEL_OK")
</pallas_src>

<mosaic_0001>
module attributes {stable_mosaic.version = 11 : i64} {
  func.func @kernel(%arg0: i32, %arg1: memref<1x8x32xf32, #tpu.memory_space<vmem>>, %arg2: memref<1x16x32xf32, #tpu.memory_space<vmem>>, %arg3: memref<1x1x16xf32, #tpu.memory_space<vmem>>, %arg4: memref<1x8x16xf32, #tpu.memory_space<vmem>>) attributes {dimension_semantics = [#tpu.dimension_semantics<parallel>], iteration_bounds = array<i64: 4>, scalar_prefetch = 0 : i64, scratch_operands = 0 : i64, tpu.core_type = #tpu.core_type<tc>, window_params = [{transform_indices = @transform_0, window_bounds = array<i64: 1, 8, 32>}, {transform_indices = @transform_1, window_bounds = array<i64: 1, 16, 32>}, {transform_indices = @transform_2, window_bounds = array<i64: 1, 1, 16>}, {transform_indices = @transform_3, window_bounds = array<i64: 1, 8, 16>}]} {
    %c0 = arith.constant 0 : index
    %c0_0 = arith.constant 0 : index
    %c0_1 = arith.constant 0 : index
    %0 = vector.load %arg1[%c0, %c0_0, %c0_1] : memref<1x8x32xf32, #tpu.memory_space<vmem>>, vector<1x8x32xf32>
    %c0_2 = arith.constant 0 : index
    %c0_3 = arith.constant 0 : index
    %c0_4 = arith.constant 0 : index
    %1 = vector.load %arg2[%c0_2, %c0_3, %c0_4] : memref<1x16x32xf32, #tpu.memory_space<vmem>>, vector<1x16x32xf32>
    %cst = arith.constant dense<0.000000e+00> : vector<1x8x16xf32>
    %2 = tpu.matmul %0, %1, %cst {dimension_numbers = #tpu.dot_dimension_numbers<[2], [2], [1], [1], [0, 0, 0, 1, 1, 1], [0], [0]>} : vector<1x8x32xf32>, vector<1x16x32xf32>, vector<1x8x16xf32> -> vector<1x8x16xf32>
    %c0_5 = arith.constant 0 : index
    %c0_6 = arith.constant 0 : index
    %c0_7 = arith.constant 0 : index
    %3 = vector.load %arg3[%c0_5, %c0_6, %c0_7] : memref<1x1x16xf32, #tpu.memory_space<vmem>>, vector<1x1x16xf32>
    %4 = vector.broadcast %3 : vector<1x1x16xf32> to vector<1x8x16xf32>
    %5 = arith.addf %2, %4 : vector<1x8x16xf32>
    %6 = vector.shape_cast %5 : vector<1x8x16xf32> to vector<8x16xf32>
    %c0_8 = arith.constant 0 : index
    %c0_9 = arith.constant 0 : index
    %c0_10 = arith.constant 0 : index
    %7 = vector.load %arg4[%c0_8, %c0_9, %c0_10] : memref<1x8x16xf32, #tpu.memory_space<vmem>>, vector<1x8x16xf32>
    %8 = vector.shape_cast %7 : vector<1x8x16xf32> to vector<8x16xf32>
    %9 = vector.shape_cast %6 : vector<8x16xf32> to vector<1x8x16xf32>
    tpu.vector_store %arg4[%c0_8, %c0_9, %c0_10], %9 {strides = array<i32>} : memref<1x8x16xf32, #tpu.memory_space<vmem>>, vector<1x8x16xf32>,
    return
  }
  func.func @transform_0(%arg0: i32) -> (i32, i32, i32) {
    %c0_i32 = arith.constant 0 : i32
    %c0_i32_0 = arith.constant 0 : i32
    %c0_i32_1 = arith.constant 0 : i32
    return %arg0, %c0_i32, %c0_i32_0 : i32, i32, i32
  }
  func.func @transform_1(%arg0: i32) -> (i32, i32, i32) {
    %c0_i32 = arith.constant 0 : i32
    %c0_i32_0 = arith.constant 0 : i32
    %c0_i32_1 = arith.constant 0 : i32
    return %arg0, %c0_i32, %c0_i32_0 : i32, i32, i32
  }
  func.func @transform_2(%arg0: i32) -> (i32, i32, i32) {
    %c0_i32 = arith.constant 0 : i32
    %c0_i32_0 = arith.constant 0 : i32
    %c0_i32_1 = arith.constant 0 : i32
    return %arg0, %c0_i32, %c0_i32_0 : i32, i32, i32
  }
  func.func @transform_3(%arg0: i32) -> (i32, i32, i32) {
    %c0_i32 = arith.constant 0 : i32
    %c0_i32_0 = arith.constant 0 : i32
    %c0_i32_1 = arith.constant 0 : i32
    return %arg0, %c0_i32, %c0_i32_0 : i32, i32, i32
  }
}

</mosaic_0001>

<bundles_post_ra>
// kernel: multiple_linear.1
= control target key start
LH: loop header
LB: loop body
LE: loop exit
PB: predicated region body
PF: predicated region fallthrough
CT: control target
= control target key end

     0   :  { %8 = vsyncpa [#allocation3], 0  ;;  %s893_s0 = inlined_call_operand.hbm [shape: f32[4,8,32], index: 0, kind: input, shape index: {}]   ;;  %s894_s1 = inlined_call_operand.hbm [shape: f32[4,16,32], index: 1, kind: input, shape index: {}]   ;;  %s895_s2 = inlined_call_operand.vmem [shape: f32[4,1,16], index: 2, kind: input, shape index: {}]   ;;  %s896_s3 = inlined_call_operand.hbm [shape: f32[4,8,16], index: 3, kind: output, shape index: {}]  }
   0x1   :  { %10 = vsyncpa [#allocation3 + $0x1], 0 }
   0x2   :  { %11 = vsyncpa [#allocation6], 0 }
   0x3   :  { %13 = vsyncpa [#allocation6 + $0x1], 0 }
   0x4   :  { %14 = vsyncpa [#allocation4], 0 }
   0x5   :  { %16 = vsyncpa [#allocation4 + $0x1], 0  ;;  %s687_s12 = smov 0   ;;  %s689_s13 = smov 0  }
   0x6   :  { %s691_s14 = smov 0   ;;  %s693_s15 = smov 0  }
   0x7 LB: > { %s708_s16 = sadd.s32 4294967295, %s658_s15   ;;  %s448_s17 = sadd.s32 4294967294, %s658_s15   ;;  %s658_s15 = sphi %s693_s15, %s913_s15   ;;  %s654_s14 = sphi %s691_s14, %s912_s14   ;;  %s650_s13 = sphi %s689_s13, %s911_s13   ;;  %s646_s12 = sphi %s687_s12, %s910_s12  }
   0x8   : > { %s712_s18 = sadd.s32 1, %s658_s15   ;;  %s29_s19 = sadd.s32 1, %s654_s14 }
   0x9   : > { %s26_s20 = ssub.s32 %s658_s15, %s712_s18  ;;  %p36_p0 = scmp.ne.s32.totalorder %s654_s14, %s650_s13 }
   0xa   : > { %p27_p1 = scmp.eq.s32.totalorder %s26_s20, 0  ;;  %p37_p2 = scmp.eq.s32.totalorder %s658_s15, 0 }
   0xb   : > { %p42_p3 = scmp.ne.s32.totalorder %s650_s13, %s646_s12  ;;  %p43_p4 = scmp.eq.s32.totalorder %s708_s16, 0 }
   0xc   : > { %s724_s21 = scalar_select %p27_p1, %s654_s14, %s29_s19  }
   0xd   : > { %p726_p5 = por %p37_p2, %p36_p0  ;;  %p730_p6 = por %p43_p4, %p42_p3 }
   0xe   : > { %p118_p7 = scmp.eq.s32.totalorder %s708_s16, 3  ;;  %p124_p8 = scmp.eq.s32.totalorder %s448_s17, 3 }
   0xf   : > { %s900_s23 = scalar_select %p730_p6, 1, 0 }
  0x10   : > { %p496_p9 = scmp.lt.s32.totalorder %s658_s15, 4  ;;  %p736_p10 = por %p118_p7, %p36_p0 }
  0x11   : > { %p740_p11 = por %p124_p8, %p42_p3  ;;  %s745_s26 = sand.u32 1, %s654_s14  }
  0x12   : > { %s901_s24 = scalar_select %p736_p10, 1, 0 }
  0x13   : > { %s902_s25 = scalar_select %p740_p11, 1, 0 }
  0x14   : > { %s452_s27 = sshll.u32 %s658_s15, 7  ;;  %s451_s28 = sshll.u32 %s745_s26, 3 }
  0x15   : > { %s752_s4 = scalar_lea.hbm %s893_s0, %s452_s27  ;;  %s148_s5 = scalar_lea.vmem [#allocation2], %s451_s28 }
  0x16   : > { %s155_s6 = sshll.u32 %s148_s5, 4  ;;  %p756_p12 = pnand %p496_p9, %p726_p5  ;;  %s760_s6 = int_to_ptr.vmem [resolvable:$true] %s155_s6 }
  0x17   : > { %s145_s8 = scalar_lea.sflag [#allocation3], %s745_s26  ;;  %s534_s9 = scalar_lea.hbm %s752_s4, 128 }
  0x18   : > { %p535_p1 = scmp.ne.s32.totalorder %s752_s4, %s534_s9  ;;  %p536_p2 = pneg %p756_p12 }
  0x19   : > { %s539_s17 = scalar_lea.hbm %s893_s0, 512  ;;  %p540_p5 = scmp.lt.s32.totalorder %s752_s4, %s893_s0 }
  0x1a   : > { %p537_p3 = pnand %p536_p2, %p535_p1  ;;  %p541_p7 = scmp.lt.s32.totalorder %s539_s17, %s534_s9 }
  0x1c   : > { %p538_p4 = pneg %p537_p3  ;;  %p542_p8 = por %p541_p7, %p540_p5 }
  0x1e   : > { %p543_p9 = pnand %p542_p8, %p538_p4 }
  0x20   : > { %546 = shalt.err (!%p543_p9)
}
  0x21   : > { %s547_s22 = scalar_lea.vmem %s760_s6, 128  ;;  %s660_s27 = smov [#allocation2]  }
  0x22   : > { %p548_p13 = scmp.ne.s32.totalorder %s760_s6, %s547_s22  ;;  %s552_s28 = sshll.u32 %s660_s27, 4  ;;  %s553_s28 = int_to_ptr.vmem [resolvable:$false] %s552_s28 }
  0x23   : > { %s554_s29 = scalar_lea.vmem %s553_s28, 256  ;;  %p555_p0 = scmp.lt.s32.totalorder %s760_s6, %s553_s28 }
  0x24   : > { %p550_p1 = pnand %p548_p13, %p536_p2  ;;  %p556_p11 = scmp.lt.s32.totalorder %s554_s29, %s547_s22 }
  0x26   : > { %p551_p3 = pneg %p550_p1  ;;  %p557_p10 = por %p556_p11, %p555_p0 }
  0x28   : > { %p558_p5 = pnand %p557_p10, %p551_p3 }
  0x2a   : > { %561 = shalt.err (!%p558_p5)
}
  0x2b   : > { %488 = dma.hbm_to_vmem [thread:$0]  (!%p756_p12), %s752_s4, 128, %s760_s6, %s145_s8  }
  0x2c   : > { %p904_p13 = scmp.lt.s32.totalorder %s658_s15, 5  ;;  %p905_p4 = scmp.ge.s32.totalorder %s658_s15, 1 }
  0x2d   : > { %s453_s5 = sshll.u32 %s745_s26, 4  ;;  %s468_s9 = sshll.u32 %s658_s15, 8 }
  0x2e   : > { %p793_p7 = pnand %p905_p4, %p904_p13  ;;  %s802_s17 = scalar_lea.hbm %s894_s1, %s468_s9 }
  0x2f   : > { %s166_s19 = scalar_lea.vmem [#allocation5], %s453_s5  ;;  %s163_s4 = scalar_lea.sflag [#allocation6], %s745_s26 }
  0x30   : > { %s173_s20 = sshll.u32 %s166_s19, 4  ;;  %s562_s6 = scalar_lea.hbm %s802_s17, 256  ;;  %s804_s20 = int_to_ptr.vmem [resolvable:$true] %s173_s20 }
  0x31   : > { %p563_p10 = scmp.ne.s32.totalorder %s802_s17, %s562_s6  ;;  %s567_s27 = scalar_lea.hbm %s894_s1, 1024 }
  0x32   : > { %p568_p8 = scmp.lt.s32.totalorder %s802_s17, %s894_s1  ;;  %p569_p9 = scmp.lt.s32.totalorder %s567_s27, %s562_s6 }
  0x33   : > { %p565_p11 = pnand %p563_p10, %p536_p2 }
  0x34   : > { %p570_p1 = por %p569_p9, %p568_p8 }
  0x35   : > { %p566_p0 = pneg %p565_p11 }
  0x37   : > { %p571_p3 = pnand %p570_p1, %p566_p0 }
  0x39   : > { %574 = shalt.err (!%p571_p3)
}
  0x3a   : > { %s575_s5 = scalar_lea.vmem %s804_s20, 256  ;;  %s661_s9 = smov [#allocation5]  }
  0x3b   : > { %p576_p5 = scmp.ne.s32.totalorder %s804_s20, %s575_s5  ;;  %s580_s10 = sshll.u32 %s661_s9, 4  ;;  %s581_s10 = int_to_ptr.vmem [resolvable:$false] %s580_s10 }
  0x3c   : > { %s582_s11 = scalar_lea.vmem %s581_s10, 512  ;;  %p583_p10 = scmp.lt.s32.totalorder %s804_s20, %s581_s10 }
  0x3d   : > { %p578_p13 = pnand %p576_p5, %p536_p2  ;;  %p584_p11 = scmp.lt.s32.totalorder %s582_s11, %s575_s5 }
  0x3f   : > { %p579_p4 = pneg %p578_p13  ;;  %p585_p6 = por %p584_p11, %p583_p10 }
  0x41   : > { %p586_p8 = pnand %p585_p6, %p579_p4 }
  0x43   : > { %589 = shalt.err (!%p586_p8)
}
  0x44   : > { %s662_s19 = smov 128   ;;  %s663_s6 = smov 8  }
  0x45   : > { %491 = dma.hbm_to_vmem [thread:$0]  (!%p756_p12), %s802_s17, 256, %s804_s20, %s163_s4, %s662_s19, %s662_s19, %s663_s6  }
  0x46   : > { %191 = sbr.rel (%p793_p7) target bundleno = 296 (0x128), region = 32  ;;  %s834_s8 = sand.u32 (!%p793_p7), 1, %s650_s13  }
  0x47   : > { %s457_s22 = sshll.u32 (!%p793_p7), %s834_s8, 3  ;;  %s194_s27 = scalar_lea.sflag (!%p793_p7), [#allocation3], %s834_s8 }
  0x48   : > { %s197_s28 = scalar_lea.vmem (!%p793_p7), [#allocation2], %s457_s22  ;;  %p907_p6 = scmp.ne.s32.totalorder (!%p793_p7), %s900_s23, 0 }
  0x4b   : > { %633 = dma.done.wait (%p907_p6), %s194_s27, 128  }
  0x4c   : > { %635 = vsyncadd (%p907_p6), %s194_s27, 4294967168  ;;  %s458_s26 = sshll.u32 %s834_s8, 4  ;;  %s203_s7 = scalar_lea.sflag [#allocation6], %s834_s8 }
  0x4d   : > { %s206_s30 = scalar_lea.vmem [#allocation5], %s458_s26 }
  0x4e   : > { %637 = dma.done.wait (%p907_p6), %s203_s7, 256  }
  0x4f   : > { %639 = vsyncadd (%p907_p6), %s203_s7, 4294967040  ;;  %v664_v0 = vmov 0.0   ;;  %vm665_vm0 = vmmov 0   ;;  %vm250_vm1 = vcmask 261120   ;;  %v242_v1 = vld [vmem:[%s206_s30 + $0x8] sm:$0xff]  ;;  %v241_v2 = vld [vmem:[%s206_s30] sm:$0xff] }
  0x50   : > { %472 = vmatprep.subr.mxu0 %v664_v0  ;;  %476 = vmatprep.mubr.msk.f32.mxu0 %vm665_vm0, %v664_v0  ;;  %v240_v3 = vld [vmem:[%s197_s28] sm:$0xff]  ;;  %p237_p12 = scmp.lt.s32.totalorder %s708_s16, 3  ;;  %s465_s29 = sshll.u32 %s708_s16, 7  ;;  %vm330_vm2 = vcmask 130048  }
  0x51   : > { %473 = vmatpush3.xpose.msk.msra.mxu0 %vm250_vm1, %v242_v1  ;;  %s236_s5 = scalar_lea.vmem [#allocation7], %s457_s22  ;;  %s857_s19 = scalar_lea.hbm %s896_s3, %s465_s29 }
  0x52   : > { %474 = vmatprep.subr.mxu0 %v664_v0  ;;  %s238_s17 = scalar_select %p237_p12, %s708_s16, 3 }
  0x53   : > { %s346_s9 = sshll.u32 %s236_s5, 4  ;;  %s333_s6 = scalar_lea.sflag [#allocation4], %s834_s8  ;;  %s347_s9 = int_to_ptr.vmem [resolvable:$true] %s346_s9 }
  0x54   : > { %s239_s4 = scalar_lea.vmem %s895_s2, %s238_s17  ;;  %s590_s27 = scalar_lea.vmem %s347_s9, 128 }
  0x55   : > { %475 = vmatpush3.xpose.msk.msra.mxu0 %vm250_vm1, %v241_v2  ;;  %v460_v4 = vld [vmem:[%s239_s4] ss:$0 sm:$0xff]  ;;  %p591_p2 = scmp.ne.s32.totalorder %s347_s9, %s590_s27  ;;  %p908_p7 = scmp.ne.s32.totalorder %s901_s24, 0 }
  0x56   : > { %s666_s16 = smov [#allocation7]  }
  0x57   : > { %p592_p0 = pnand %p591_p2, %p908_p7  ;;  %s594_s22 = sshll.u32 %s666_s16, 4  ;;  %s595_s22 = int_to_ptr.vmem [resolvable:$false] %s594_s22 }
  0x58   : > { %477 = vmatmul.mubr.msk.f32.vlgmr.msra.gmra.mxu0 %vm250_vm1, %v240_v3  ;;  %s596_s28 = scalar_lea.vmem %s595_s22, 256  ;;  %p597_p1 = scmp.lt.s32.totalorder %s347_s9, %s595_s22 }
  0x59   : > { %p593_p9 = pneg %p592_p0  ;;  %p598_p3 = scmp.lt.s32.totalorder %s596_s28, %s590_s27 }
  0x5b   : > { %p599_p5 = por %p598_p3, %p597_p1 }
  0x5d   : > { %p600_p13 = pnand %p599_p5, %p593_p9 }
 0x118   : > { %v326_v5 = vpop.f32.mrf.mxu0 }
 0x119   : > { %v327_v6 = vadd.f32 %v460_v4, %v326_v5 }
 0x11a   : > { %v478_v7 = vpop.f32.mrf.mxu0 }
 0x11b   : > { %331 = vst.msk [vmem:[%s236_s5] sm:$0xff] %vm330_vm2, %v327_v6 }
 0x11c   : > { %603 = shalt.err (!%p600_p13)
}
 0x11d   : > { %s604_s26 = scalar_lea.hbm %s857_s19, 128  ;;  %s608_s30 = scalar_lea.hbm %s896_s3, 512 }
 0x11e   : > { %p605_p4 = scmp.ne.s32.totalorder %s857_s19, %s604_s26  ;;  %p609_p8 = scmp.lt.s32.totalorder %s857_s19, %s896_s3 }
 0x11f   : > { %p610_p6 = scmp.lt.s32.totalorder %s608_s30, %s604_s26 }
 0x120   : > { %p606_p10 = pnand %p605_p4, %p908_p7 }
 0x121   : > { %p611_p12 = por %p610_p6, %p609_p8 }
 0x122   : > { %p607_p11 = pneg %p606_p10 }
 0x124   : > { %p612_p2 = pnand %p611_p12, %p607_p11 }
 0x126   : > { %615 = shalt.err (!%p612_p2)
}
 0x127   : > { %483 = dma.vmem_to_hbm [thread:$0]  (%p908_p7), %s347_s9, 128, %s857_s19, %s333_s6  }
 0x128 PF: > { %p497_p0 = scmp.ge.s32.totalorder %s658_s15, 2  ;;  %s358_s20 = sand.u32 1, %s646_s12  }
 0x129   : > { %p909_p9 = scmp.ne.s32.totalorder %s902_s25, 0  ;;  %s359_s4 = scalar_lea.sflag [#allocation4], %s358_s20 }
 0x12b   : > { %p493_p1 = pnand %p497_p0, %p909_p9 }
 0x12d   : > { %p494_p3 = pneg %p493_p1 }
 0x12f   : > { %641 = dma.done.wait (%p494_p3), %s359_s4, 128  }
 0x130   : > { %643 = vsyncadd (%p494_p3), %s359_s4, 4294967168  ;;  %p19_p5 = scmp.ge.s32.totalorder %s712_s18, 6   ;;  %s910_s12 = smov %s650_s13 }
 0x131   : > { %s911_s13 = smov %s654_s14  ;;  %s912_s14 = smov %s724_s21 }
 0x132   : > { %s913_s15 = smov %s712_s18  ;;  %21 = sbr.rel (!%p19_p5) target bundleno = 7 (0x7), region = 93 }
 0x137   :  { %364 = vsyncpa [#allocation3], 1 }
 0x138   :  { %366 = vsyncpa [#allocation3 + $0x1], 1 }
 0x139   :  { %367 = vsyncpa [#allocation6], 1 }
 0x13a   :  { %369 = vsyncpa [#allocation6 + $0x1], 1 }
 0x13b   :  { %370 = vsyncpa [#allocation4], 1 }
 0x13c   :  { %372 = vsyncpa [#allocation4 + $0x1], 1 }

</bundles_post_ra>
